<compile_context>
chip_gen: v7x
topology: tpu7x:2x2x1
jax: 0.10.0
libtpu: 0.0.40
codegen_flags: <defaults>
</compile_context>

<pallas_src>
import functools

import jax
import jax.numpy as jnp
from jax.experimental import pallas as pl
from jax.experimental.pallas import tpu as pltpu


# ----------------------------------------------------------------------------
# Kernel 1: gating (linear -> softmax -> top-k).
# Outputs:
#   topi  (B, top_k)    int32  -- user-facing indices (== torch.topk indices)
#   topwt (top_k, B, 1) f32    -- per-step mixing-weight blocks for kernel 2
#   eids  (1, top_k)    int32  -- row-0 expert ids; consumed directly as the
#                                 scalar-prefetch operand of kernel 2.
# NOTE: top-k uses exact float equality with first-index tie-break, matching
# jax.lax.top_k / torch.topk on softmax outputs (NaN logits are not handled).
# ----------------------------------------------------------------------------
def gate_topk_kernel(x_ref, wgt_ref, bg_ref, topi_ref, topwt_ref, eids_ref):
    top_k = topi_ref.shape[1]

    # logits = x @ Wg^T + bg   (Wg pre-transposed to [D, E] -> plain dot)
    logits = jnp.dot(x_ref[...], wgt_ref[...],
                     preferred_element_type=jnp.float32) + bg_ref[...]
    # Numerically stable softmax over the experts axis.
    m = jnp.max(logits, axis=-1, keepdims=True)
    e = jnp.exp(logits - m)
    probs = e / jnp.sum(e, axis=-1, keepdims=True)

    B, E = probs.shape
    lane_iota = jax.lax.broadcasted_iota(jnp.int32, (B, E), 1)

    idxs = []
    p = probs
    for k in range(top_k):                                   # static, tiny loop
        pmax = jnp.max(p, axis=-1, keepdims=True)            # (B, 1)
        idx = jnp.min(jnp.where(p == pmax, lane_iota, E),
                      axis=-1, keepdims=True)                # (B, 1) first argmax
        topwt_ref[k] = pmax                                  # mixing weight block k
        idxs.append(idx)
        p = jnp.where(lane_iota == idx, -1.0, p)             # mask out found max

    topi = jnp.concatenate(idxs, axis=-1).astype(jnp.int32)  # (B, top_k)
    topi_ref[...] = topi
    eids_ref[...] = topi[0:1, :]                             # row-0 quirk of the ref


# ----------------------------------------------------------------------------
# Kernel 2: apply the selected LoRA-FFN expert(s), accumulate weighted outputs.
# Grid axis = top_k (reduction into a resident f32 accumulator). The selected
# expert ids arrive via scalar prefetch and drive data-dependent index_maps so
# ONLY the chosen expert's weights are DMA'd from HBM.
# ----------------------------------------------------------------------------
def moe_expert_kernel(eids_ref,          # scalar-prefetch: (1, top_k) int32 (SMEM)
                      x_ref,             # (B, D)            compute dtype
                      wk_ref,            # (B, 1)   f32      mixing weight, step k
                      w1t_ref,           # (D, H)            selected expert W1^T
                      p1_ref,            # (1+r, H) f32      [b1 ; A1^T]
                      bl_ref,            # (D+H, r) f32      [B1^T ; B2^T]
                      w2t_ref,           # (H, D)            selected expert W2^T
                      p2_ref,            # (1+r, D) f32      [b2 ; A2^T]
                      o_ref,             # (B, D)
                      acc_ref):          # (B, D)   f32 scratch
    del eids_ref  # only used by the data-dependent index_maps
    k = pl.program_id(0)

    @pl.when(k == 0)
    def _():
        acc_ref[...] = jnp.zeros_like(acc_ref)

    D = x_ref.shape[1]
    H = w1t_ref.shape[1]
    r = p1_ref.shape[0] - 1

    x = x_ref[...]
    b1, a1t = p1_ref[0:1, :], p1_ref[1:1 + r, :]     # static slices (views)
    b2, a2t = p2_ref[0:1, :], p2_ref[1:1 + r, :]
    bl1t, bl2t = bl_ref[0:D, :], bl_ref[D:D + H, :]

    # LoRA layer 1: h = relu(x @ W1^T + (x @ B1^T) @ A1^T + b1)   (f32 accumulation)
    h = jnp.dot(x, w1t_ref[...], preferred_element_type=jnp.float32)
    h += jnp.dot(jnp.dot(x, bl1t, preferred_element_type=jnp.float32),
                 a1t, preferred_element_type=jnp.float32)
    h = jnp.maximum(h + b1, 0.0)
    hc = h.astype(w2t_ref.dtype)                      # bf16 in streaming mode, no-op in f32

    # LoRA layer 2: y = h @ W2^T + (h @ B2^T) @ A2^T + b2
    y = jnp.dot(hc, w2t_ref[...], preferred_element_type=jnp.float32)
    y += jnp.dot(jnp.dot(hc, bl2t, preferred_element_type=jnp.float32),
                 a2t, preferred_element_type=jnp.float32)
    y += b2

    acc_ref[...] += y * wk_ref[...]                   # per-row mixing weight

    @pl.when(k == pl.num_programs(0) - 1)
    def _():
        o_ref[...] = acc_ref[...].astype(o_ref.dtype)


# ----------------------------------------------------------------------------
# Wrapper
# ----------------------------------------------------------------------------
def prepare_expert_params(experts, weight_dtype=jnp.float32):
    """Stack, pre-transpose and pack per-expert parameters.

    experts: list of (W1[H,D], b1[H], A1[H,r], B1[r,D], W2[D,H], b2[D], A2[D,r], B2[r,H])
    Returns:
      w1t [E, D, H]   (weight_dtype)    p1 [E, 1+r, H] f32 = [b1 ; A1^T]
      bl  [E, D+H, r] f32 = [B1^T ; B2^T]
      w2t [E, H, D]   (weight_dtype)    p2 [E, 1+r, D] f32 = [b2 ; A2^T]
    Only the big streamed matrices take `weight_dtype` (bf16 halves HBM traffic
    at production sizes); the tiny packed LoRA/bias buffers stay f32.
    """
    w1t, p1, bl, w2t, p2 = [], [], [], [], []
    for (W1, b1, A1, B1, W2, b2, A2, B2) in experts:
        H, D = W1.shape
        w1t.append(W1.T)                                               # (D, H)
        p1.append(jnp.concatenate([b1.reshape(1, H), A1.T], axis=0))   # (1+r, H)
        bl.append(jnp.concatenate([B1.T, B2.T], axis=0))               # (D+H, r)
        w2t.append(W2.T)                                               # (H, D)
        p2.append(jnp.concatenate([b2.reshape(1, D), A2.T], axis=0))   # (1+r, D)
    return (jnp.stack(w1t).astype(weight_dtype),
            jnp.stack(p1).astype(jnp.float32),
            jnp.stack(bl).astype(jnp.float32),
            jnp.stack(w2t).astype(weight_dtype),
            jnp.stack(p2).astype(jnp.float32))


@functools.partial(jax.jit, static_argnames=("top_k",))
def moe_forward(x, gate_w, gate_b, w1t, p1, bl, w2t, p2, *, top_k=1):
    B, D = x.shape
    E = gate_w.shape[0]
    H = w1t.shape[2]
    r = p1.shape[1] - 1
    cdt = w1t.dtype                        # expert compute/streaming dtype

    # --- Kernel 1: gating (single invocation, whole tiny arrays in VMEM). ---
    # Gating always runs in f32 so expert selection is bit-identical to the
    # reference even when expert weights are streamed in bf16.
    xg = x.astype(jnp.float32)
    wg_t = gate_w.T.astype(jnp.float32)                  # [D, E]
    bg2d = gate_b.reshape(1, E).astype(jnp.float32)
    topi, topwt, eids = pl.pallas_call(
        gate_topk_kernel,
        out_shape=(jax.ShapeDtypeStruct((B, top_k), jnp.int32),
                   jax.ShapeDtypeStruct((top_k, B, 1), jnp.float32),
                   jax.ShapeDtypeStruct((1, top_k), jnp.int32)),
        in_specs=[pl.BlockSpec(memory_space=pltpu.MemorySpace.VMEM)] * 3,
        out_specs=(pl.BlockSpec(memory_space=pltpu.MemorySpace.VMEM),
                   pl.BlockSpec(memory_space=pltpu.MemorySpace.VMEM),
                   pl.BlockSpec(memory_space=pltpu.MemorySpace.VMEM)),
    )(xg, wg_t, bg2d)

    # --- Kernel 2: selected-expert LoRA-FFN, weighted accumulation over top_k. ---
    xr = x.astype(cdt)

    fix = lambda k, eids: (0, 0)            # same block every grid step
    wkm = lambda k, eids: (k, 0, 0)         # mixing-weight block for step k
    ex = lambda k, eids: (eids[0, k], 0, 0)  # data-dependent expert weight fetch

    out = pl.pallas_call(
        moe_expert_kernel,
        out_shape=jax.ShapeDtypeStruct((B, D), x.dtype),
        grid_spec=pltpu.PrefetchScalarGridSpec(
            num_scalar_prefetch=1,
            grid=(top_k,),
            in_specs=[
                pl.BlockSpec((B, D), fix),              # x
                pl.BlockSpec((None, B, 1), wkm),        # per-step mixing weight
                pl.BlockSpec((None, D, H), ex),         # W1^T
                pl.BlockSpec((None, 1 + r, H), ex),     # [b1 ; A1^T]
                pl.BlockSpec((None, D + H, r), ex),     # [B1^T ; B2^T]
                pl.BlockSpec((None, H, D), ex),         # W2^T
                pl.BlockSpec((None, 1 + r, D), ex),     # [b2 ; A2^T]
            ],
            out_specs=pl.BlockSpec((B, D), fix),
            scratch_shapes=[pltpu.VMEM((B, D), jnp.float32)],
        ),
        compiler_params=pltpu.CompilerParams(
            dimension_semantics=("arbitrary",)),        # top_k is a reduction axis
    )(eids, xr, topwt, w1t, p1, bl, w2t, p2)

    return out, topi


if __name__ == "__main__":
    key = jax.random.PRNGKey(0)
    B, D, H, E, r, TOP_K = 8, 32, 64, 4, 4, 1

    ks = jax.random.split(key, 3 + 6 * E)
    x = jax.random.normal(ks[0], (B, D), jnp.float32)
    gate_w = jax.random.normal(ks[1], (E, D), jnp.float32) * 0.1
    gate_b = jax.random.normal(ks[2], (E,), jnp.float32) * 0.1

    experts = []
    ki = 3
    for _ in range(E):
        W1 = jax.random.normal(ks[ki + 0], (H, D), jnp.float32) * 0.01
        A1 = jax.random.normal(ks[ki + 1], (H, r), jnp.float32) * 0.01
        B1 = jax.random.normal(ks[ki + 2], (r, D), jnp.float32) * 0.01
        b1 = jnp.zeros((H,), jnp.float32)
        W2 = jax.random.normal(ks[ki + 3], (D, H), jnp.float32) * 0.01
        A2 = jax.random.normal(ks[ki + 4], (D, r), jnp.float32) * 0.01
        B2 = jax.random.normal(ks[ki + 5], (r, H), jnp.float32) * 0.01
        b2 = jnp.zeros((D,), jnp.float32)
        experts.append((W1, b1, A1, B1, W2, b2, A2, B2))
        ki += 6

    # Pure-JAX reference mirroring PyTorch MoELayer.forward exactly
    # (including the intentional row-0 expert-selection quirk).
    gate_logits = x @ gate_w.T + gate_b
    probs = jax.nn.softmax(gate_logits, axis=-1)
    ref_topw, ref_topi = jax.lax.top_k(probs, TOP_K)
    ref_out = jnp.zeros_like(x)
    for i in range(TOP_K):
        eid = int(ref_topi[0, i])                 # expert picked by FIRST row
        W1, b1, A1, B1, W2, b2, A2, B2 = experts[eid]
        hh = jnp.maximum(x @ (W1 + A1 @ B1).T + b1, 0.0)
        eo = hh @ (W2 + A2 @ B2).T + b2
        ref_out = ref_out + eo * ref_topw[:, i][:, None]

    # --- exact f32 path: preserves the PyTorch module's numerics ---
    w1t, p1, bl, w2t, p2 = prepare_expert_params(experts, jnp.float32)
    out, topi = moe_forward(x, gate_w, gate_b, w1t, p1, bl, w2t, p2, top_k=TOP_K)
    out = jax.block_until_ready(out)
    assert out.shape == (B, D)
    assert jnp.array_equal(topi, ref_topi)
    assert jnp.allclose(out, ref_out, atol=1e-5, rtol=1e-4)

    # --- bf16 weight-streaming path (production mode: halves HBM traffic for
    #     the big expert matrices; f32 accumulation keeps accuracy) ---
    w1t_b, p1_b, bl_b, w2t_b, p2_b = prepare_expert_params(experts, jnp.bfloat16)
    out_b, topi_b = moe_forward(x, gate_w, gate_b,
                                w1t_b, p1_b, bl_b, w2t_b, p2_b, top_k=TOP_K)
    out_b = jax.block_until_ready(out_b)
    assert jnp.array_equal(topi_b, ref_topi)
    assert jnp.allclose(out_b.astype(jnp.float32), ref_out, atol=3e-3, rtol=3e-2)

    print("KERNEL_OK")
</pallas_src>

<mosaic_0001>
module attributes {stable_mosaic.version = 11 : i64} {
  func.func @gate_topk_kernel(%arg0: memref<8x32xf32, #tpu.memory_space<vmem>>, %arg1: memref<32x4xf32, #tpu.memory_space<vmem>>, %arg2: memref<1x4xf32, #tpu.memory_space<vmem>>, %arg3: memref<8x1xi32, #tpu.memory_space<vmem>>, %arg4: memref<1x8x1xf32, #tpu.memory_space<vmem>>, %arg5: memref<1x1xi32, #tpu.memory_space<vmem>>) attributes {dimension_semantics = [], scalar_prefetch = 0 : i64, scratch_operands = 0 : i64, tpu.core_type = #tpu.core_type<tc>} {
    %c0 = arith.constant 0 : index
    %c0_0 = arith.constant 0 : index
    %0 = vector.load %arg0[%c0, %c0_0] : memref<8x32xf32, #tpu.memory_space<vmem>>, vector<8x32xf32>
    %c0_1 = arith.constant 0 : index
    %c0_2 = arith.constant 0 : index
    %1 = vector.load %arg1[%c0_1, %c0_2] : memref<32x4xf32, #tpu.memory_space<vmem>>, vector<32x4xf32>
    %cst = arith.constant dense<0.000000e+00> : vector<8x4xf32>
    %2 = tpu.matmul %0, %1, %cst {dimension_numbers = #tpu.dot_dimension_numbers<[1], [0], [0], [1], [0, 0, 1, 1], [], []>} : vector<8x32xf32>, vector<32x4xf32>, vector<8x4xf32> -> vector<8x4xf32>
    %c0_3 = arith.constant 0 : index
    %c0_4 = arith.constant 0 : index
    %3 = vector.load %arg2[%c0_3, %c0_4] : memref<1x4xf32, #tpu.memory_space<vmem>>, vector<1x4xf32>
    %4 = vector.broadcast %3 : vector<1x4xf32> to vector<8x4xf32>
    %5 = arith.addf %2, %4 : vector<8x4xf32>
    %cst_5 = arith.constant dense<0xFF800000> : vector<8xf32>
    %6 = vector.multi_reduction <maximumf>, %5, %cst_5 [1] : vector<8x4xf32> to vector<8xf32>
    %7 = vector.shape_cast %6 : vector<8xf32> to vector<8x1xf32>
    %8 = vector.broadcast %7 : vector<8x1xf32> to vector<8x4xf32>
    %9 = arith.subf %5, %8 : vector<8x4xf32>
    %10 = math.exp %9 : vector<8x4xf32>
    %cst_6 = arith.constant dense<0.000000e+00> : vector<8xf32>
    %11 = vector.multi_reduction <add>, %10, %cst_6 [1] : vector<8x4xf32> to vector<8xf32>
    %12 = vector.shape_cast %11 : vector<8xf32> to vector<8x1xf32>
    %13 = vector.broadcast %12 : vector<8x1xf32> to vector<8x4xf32>
    %14 = arith.divf %10, %13 : vector<8x4xf32>
    %15 = tpu.iota {dimensions = array<i32: 1>} : vector<8x4xi32>
    %cst_7 = arith.constant dense<0xFF800000> : vector<8xf32>
    %16 = vector.multi_reduction <maximumf>, %14, %cst_7 [1] : vector<8x4xf32> to vector<8xf32>
    %17 = vector.shape_cast %16 : vector<8xf32> to vector<8x1xf32>
    %18 = vector.broadcast %17 : vector<8x1xf32> to vector<8x4xf32>
    %19 = arith.cmpf oeq, %14, %18 : vector<8x4xf32>
    %c4_i32 = arith.constant 4 : i32
    %20 = vector.broadcast %c4_i32 : i32 to vector<8x4xi32>
    %21 = arith.select %19, %15, %20 : vector<8x4xi1>, vector<8x4xi32>
    %cst_8 = arith.constant dense<2147483647> : vector<8xi32>
    %22 = vector.multi_reduction <minsi>, %21, %cst_8 [1] : vector<8x4xi32> to vector<8xi32>
    %23 = vector.shape_cast %22 : vector<8xi32> to vector<8x1xi32>
    %c0_9 = arith.constant 0 : index
    %c0_10 = arith.constant 0 : index
    %c0_11 = arith.constant 0 : index
    %24 = vector.load %arg4[%c0_9, %c0_10, %c0_11] : memref<1x8x1xf32, #tpu.memory_space<vmem>>, vector<1x8x1xf32>
    %25 = vector.shape_cast %24 : vector<1x8x1xf32> to vector<8x1xf32>
    %26 = vector.shape_cast %17 : vector<8x1xf32> to vector<1x8x1xf32>
    tpu.vector_store %arg4[%c0_9, %c0_10, %c0_11], %26 {strides = array<i32>} : memref<1x8x1xf32, #tpu.memory_space<vmem>>, vector<1x8x1xf32>,
    %c0_12 = arith.constant 0 : index
    %c0_13 = arith.constant 0 : index
    %27 = vector.load %arg3[%c0_12, %c0_13] : memref<8x1xi32, #tpu.memory_space<vmem>>, vector<8x1xi32>
    tpu.vector_store %arg3[%c0_12, %c0_13], %23 {strides = array<i32>} : memref<8x1xi32, #tpu.memory_space<vmem>>, vector<8x1xi32>,
    %28 = vector.extract_strided_slice %23 {offsets = [0, 0], sizes = [1, 1], strides = [1, 1]} : vector<8x1xi32> to vector<1x1xi32>
    %c0_14 = arith.constant 0 : index
    %c0_15 = arith.constant 0 : index
    %29 = vector.load %arg5[%c0_14, %c0_15] : memref<1x1xi32, #tpu.memory_space<vmem>>, vector<1x1xi32>
    tpu.vector_store %arg5[%c0_14, %c0_15], %28 {strides = array<i32>} : memref<1x1xi32, #tpu.memory_space<vmem>>, vector<1x1xi32>,
    return
  }
}

module attributes {stable_mosaic.version = 11 : i64} {
  func.func @moe_expert_kernel(%arg0: i32, %arg1: memref<1x1xi32, #tpu.memory_space<smem>>, %arg2: memref<8x32xf32, #tpu.memory_space<vmem>>, %arg3: memref<1x8x1xf32, #tpu.memory_space<vmem>>, %arg4: memref<1x32x64xf32, #tpu.memory_space<vmem>>, %arg5: memref<1x5x64xf32, #tpu.memory_space<vmem>>, %arg6: memref<1x96x4xf32, #tpu.memory_space<vmem>>, %arg7: memref<1x64x32xf32, #tpu.memory_space<vmem>>, %arg8: memref<1x5x32xf32, #tpu.memory_space<vmem>>, %arg9: memref<8x32xf32, #tpu.memory_space<vmem>>, %arg10: memref<8x32xf32, #tpu.memory_space<vmem>>) attributes {dimension_semantics = [#tpu.dimension_semantics<arbitrary>], iteration_bounds = array<i64: 1>, scalar_prefetch = 1 : i64, scratch_operands = 1 : i64, tpu.core_type = #tpu.core_type<tc>, window_params = [{pipeline_mode = #tpu.pipeline_mode<synchronous>, transform_indices = @transform_0, window_bounds = array<i64: 8, 32>}, {transform_indices = @transform_1, window_bounds = array<i64: 1, 8, 1>}, {transform_indices = @transform_2, window_bounds = array<i64: 1, 32, 64>}, {transform_indices = @transform_3, window_bounds = array<i64: 1, 5, 64>}, {transform_indices = @transform_4, window_bounds = array<i64: 1, 96, 4>}, {transform_indices = @transform_5, window_bounds = array<i64: 1, 64, 32>}, {transform_indices = @transform_6, window_bounds = array<i64: 1, 5, 32>}, {pipeline_mode = #tpu.pipeline_mode<synchronous>, transform_indices = @transform_7, window_bounds = array<i64: 8, 32>}]} {
    %c0_i32 = arith.constant 0 : i32
    %0 = arith.cmpi eq, %arg0, %c0_i32 : i32
    %1 = arith.extui %0 : i1 to i32
    %c0_i32_0 = arith.constant 0 : i32
    %2 = arith.cmpi ne, %1, %c0_i32_0 : i32
    scf.if %2 {
      %cst_39 = arith.constant 0.000000e+00 : f32
      %44 = vector.broadcast %cst_39 : f32 to vector<8x32xf32>
      %c0_40 = arith.constant 0 : index
      %c0_41 = arith.constant 0 : index
      %45 = vector.load %arg10[%c0_40, %c0_41] : memref<8x32xf32, #tpu.memory_space<vmem>>, vector<8x32xf32>
      tpu.vector_store %arg10[%c0_40, %c0_41], %44 {strides = array<i32>} : memref<8x32xf32, #tpu.memory_space<vmem>>, vector<8x32xf32>,
    } else {
    }
    %c0 = arith.constant 0 : index
    %c0_1 = arith.constant 0 : index
    %3 = vector.load %arg2[%c0, %c0_1] : memref<8x32xf32, #tpu.memory_space<vmem>>, vector<8x32xf32>
    %c0_2 = arith.constant 0 : index
    %c0_3 = arith.constant 0 : index
    %c0_4 = arith.constant 0 : index
    %4 = vector.load %arg5[%c0_2, %c0_3, %c0_4] : memref<1x5x64xf32, #tpu.memory_space<vmem>>, vector<1x1x64xf32>
    %5 = vector.shape_cast %4 : vector<1x1x64xf32> to vector<1x64xf32>
    %c0_5 = arith.constant 0 : index
    %c1 = arith.constant 1 : index
    %c0_6 = arith.constant 0 : index
    %6 = vector.load %arg5[%c0_5, %c1, %c0_6] : memref<1x5x64xf32, #tpu.memory_space<vmem>>, vector<1x4x64xf32>
    %7 = vector.shape_cast %6 : vector<1x4x64xf32> to vector<4x64xf32>
    %c0_7 = arith.constant 0 : index
    %c0_8 = arith.constant 0 : index
    %c0_9 = arith.constant 0 : index
    %8 = vector.load %arg8[%c0_7, %c0_8, %c0_9] : memref<1x5x32xf32, #tpu.memory_space<vmem>>, vector<1x1x32xf32>
    %9 = vector.shape_cast %8 : vector<1x1x32xf32> to vector<1x32xf32>
    %c0_10 = arith.constant 0 : index
    %c1_11 = arith.constant 1 : index
    %c0_12 = arith.constant 0 : index
    %10 = vector.load %arg8[%c0_10, %c1_11, %c0_12] : memref<1x5x32xf32, #tpu.memory_space<vmem>>, vector<1x4x32xf32>
    %11 = vector.shape_cast %10 : vector<1x4x32xf32> to vector<4x32xf32>
    %c0_13 = arith.constant 0 : index
    %c0_14 = arith.constant 0 : index
    %c0_15 = arith.constant 0 : index
    %12 = vector.load %arg6[%c0_13, %c0_14, %c0_15] : memref<1x96x4xf32, #tpu.memory_space<vmem>>, vector<1x32x4xf32>
    %13 = vector.shape_cast %12 : vector<1x32x4xf32> to vector<32x4xf32>
    %c0_16 = arith.constant 0 : index
    %c32 = arith.constant 32 : index
    %c0_17 = arith.constant 0 : index
    %14 = vector.load %arg6[%c0_16, %c32, %c0_17] : memref<1x96x4xf32, #tpu.memory_space<vmem>>, vector<1x64x4xf32>
    %15 = vector.shape_cast %14 : vector<1x64x4xf32> to vector<64x4xf32>
    %c0_18 = arith.constant 0 : index
    %c0_19 = arith.constant 0 : index
    %c0_20 = arith.constant 0 : index
    %16 = vector.load %arg4[%c0_18, %c0_19, %c0_20] : memref<1x32x64xf32, #tpu.memory_space<vmem>>, vector<1x32x64xf32>
    %17 = vector.shape_cast %16 : vector<1x32x64xf32> to vector<32x64xf32>
    %cst = arith.constant dense<0.000000e+00> : vector<8x64xf32>
    %18 = tpu.matmul %3, %17, %cst {dimension_numbers = #tpu.dot_dimension_numbers<[1], [0], [0], [1], [0, 0, 1, 1], [], []>} : vector<8x32xf32>, vector<32x64xf32>, vector<8x64xf32> -> vector<8x64xf32>
    %cst_21 = arith.constant dense<0.000000e+00> : vector<8x4xf32>
    %19 = tpu.matmul %3, %13, %cst_21 {dimension_numbers = #tpu.dot_dimension_numbers<[1], [0], [0], [1], [0, 0, 1, 1], [], []>} : vector<8x32xf32>, vector<32x4xf32>, vector<8x4xf32> -> vector<8x4xf32>
    %cst_22 = arith.constant dense<0.000000e+00> : vector<8x64xf32>
    %20 = tpu.matmul %19, %7, %cst_22 {dimension_numbers = #tpu.dot_dimension_numbers<[1], [0], [0], [1], [0, 0, 1, 1], [], []>} : vector<8x4xf32>, vector<4x64xf32>, vector<8x64xf32> -> vector<8x64xf32>
    %21 = arith.addf %18, %20 : vector<8x64xf32>
    %22 = vector.broadcast %5 : vector<1x64xf32> to vector<8x64xf32>
    %23 = arith.addf %21, %22 : vector<8x64xf32>
    %cst_23 = arith.constant 0.000000e+00 : f32
    %24 = vector.broadcast %cst_23 : f32 to vector<8x64xf32>
    %25 = arith.maximumf %23, %24 : vector<8x64xf32>
    %c0_24 = arith.constant 0 : index
    %c0_25 = arith.constant 0 : index
    %c0_26 = arith.constant 0 : index
    %26 = vector.load %arg7[%c0_24, %c0_25, %c0_26] : memref<1x64x32xf32, #tpu.memory_space<vmem>>, vector<1x64x32xf32>
    %27 = vector.shape_cast %26 : vector<1x64x32xf32> to vector<64x32xf32>
    %cst_27 = arith.constant dense<0.000000e+00> : vector<8x32xf32>
    %28 = tpu.matmul %25, %27, %cst_27 {dimension_numbers = #tpu.dot_dimension_numbers<[1], [0], [0], [1], [0, 0, 1, 1], [], []>} : vector<8x64xf32>, vector<64x32xf32>, vector<8x32xf32> -> vector<8x32xf32>
    %cst_28 = arith.constant dense<0.000000e+00> : vector<8x4xf32>
    %29 = tpu.matmul %25, %15, %cst_28 {dimension_numbers = #tpu.dot_dimension_numbers<[1], [0], [0], [1], [0, 0, 1, 1], [], []>} : vector<8x64xf32>, vector<64x4xf32>, vector<8x4xf32> -> vector<8x4xf32>
    %cst_29 = arith.constant dense<0.000000e+00> : vector<8x32xf32>
    %30 = tpu.matmul %29, %11, %cst_29 {dimension_numbers = #tpu.dot_dimension_numbers<[1], [0], [0], [1], [0, 0, 1, 1], [], []>} : vector<8x4xf32>, vector<4x32xf32>, vector<8x32xf32> -> vector<8x32xf32>
    %31 = arith.addf %28, %30 : vector<8x32xf32>
    %32 = vector.broadcast %9 : vector<1x32xf32> to vector<8x32xf32>
    %33 = arith.addf %31, %32 : vector<8x32xf32>
    %c0_30 = arith.constant 0 : index
    %c0_31 = arith.constant 0 : index
    %34 = vector.load %arg10[%c0_30, %c0_31] : memref<8x32xf32, #tpu.memory_space<vmem>>, vector<8x32xf32>
    %c0_32 = arith.constant 0 : index
    %c0_33 = arith.constant 0 : index
    %c0_34 = arith.constant 0 : index
    %35 = vector.load %arg3[%c0_32, %c0_33, %c0_34] : memref<1x8x1xf32, #tpu.memory_space<vmem>>, vector<1x8x1xf32>
    %36 = vector.shape_cast %35 : vector<1x8x1xf32> to vector<8x1xf32>
    %37 = vector.broadcast %36 : vector<8x1xf32> to vector<8x32xf32>
    %38 = arith.mulf %33, %37 : vector<8x32xf32>
    %39 = arith.addf %34, %38 : vector<8x32xf32>
    %c0_35 = arith.constant 0 : index
    %c0_36 = arith.constant 0 : index
    %40 = vector.load %arg10[%c0_35, %c0_36] : memref<8x32xf32, #tpu.memory_space<vmem>>, vector<8x32xf32>
    tpu.vector_store %arg10[%c0_35, %c0_36], %39 {strides = array<i32>} : memref<8x32xf32, #tpu.memory_space<vmem>>, vector<8x32xf32>,
    %c0_i32_37 = arith.constant 0 : i32
    %41 = arith.cmpi eq, %arg0, %c0_i32_37 : i32
    %42 = arith.extui %41 : i1 to i32
    %c0_i32_38 = arith.constant 0 : i32
    %43 = arith.cmpi ne, %42, %c0_i32_38 : i32
    scf.if %43 {
      %c0_39 = arith.constant 0 : index
      %c0_40 = arith.constant 0 : index
      %44 = vector.load %arg10[%c0_39, %c0_40] : memref<8x32xf32, #tpu.memory_space<vmem>>, vector<8x32xf32>
      %c0_41 = arith.constant 0 : index
      %c0_42 = arith.constant 0 : index
      %45 = vector.load %arg9[%c0_41, %c0_42] : memref<8x32xf32, #tpu.memory_space<vmem>>, vector<8x32xf32>
      tpu.vector_store %arg9[%c0_41, %c0_42], %44 {strides = array<i32>} : memref<8x32xf32, #tpu.memory_space<vmem>>, vector<8x32xf32>,
    } else {
    }
    return
  }
  func.func @transform_0(%arg0: i32, %arg1: memref<1x1xi32, #tpu.memory_space<smem>>) -> (i32, i32) {
    %c0_i32 = arith.constant 0 : i32
    %c0_i32_0 = arith.constant 0 : i32
    %c0_i32_1 = arith.constant 0 : i32
    return %c0_i32, %c0_i32_0 : i32, i32
  }
  func.func @transform_1(%arg0: i32, %arg1: memref<1x1xi32, #tpu.memory_space<smem>>) -> (i32, i32, i32) {
    %c0_i32 = arith.constant 0 : i32
    %c0_i32_0 = arith.constant 0 : i32
    %c0_i32_1 = arith.constant 0 : i32
    return %arg0, %c0_i32, %c0_i32_0 : i32, i32, i32
  }
  func.func @transform_2(%arg0: i32, %arg1: memref<1x1xi32, #tpu.memory_space<smem>>) -> (i32, i32, i32) {
    %c0 = arith.constant 0 : index
    %0 = arith.index_cast %arg0 : i32 to index
    %1 = memref.load %arg1[%c0, %0] : memref<1x1xi32, #tpu.memory_space<smem>>
    %c0_i32 = arith.constant 0 : i32
    %c0_i32_0 = arith.constant 0 : i32
    %c0_i32_1 = arith.constant 0 : i32
    return %1, %c0_i32, %c0_i32_0 : i32, i32, i32
  }
  func.func @transform_3(%arg0: i32, %arg1: memref<1x1xi32, #tpu.memory_space<smem>>) -> (i32, i32, i32) {
    %c0 = arith.constant 0 : index
    %0 = arith.index_cast %arg0 : i32 to index
    %1 = memref.load %arg1[%c0, %0] : memref<1x1xi32, #tpu.memory_space<smem>>
    %c0_i32 = arith.constant 0 : i32
    %c0_i32_0 = arith.constant 0 : i32
    %c0_i32_1 = arith.constant 0 : i32
    return %1, %c0_i32, %c0_i32_0 : i32, i32, i32
  }
  func.func @transform_4(%arg0: i32, %arg1: memref<1x1xi32, #tpu.memory_space<smem>>) -> (i32, i32, i32) {
    %c0 = arith.constant 0 : index
    %0 = arith.index_cast %arg0 : i32 to index
    %1 = memref.load %arg1[%c0, %0] : memref<1x1xi32, #tpu.memory_space<smem>>
    %c0_i32 = arith.constant 0 : i32
    %c0_i32_0 = arith.constant 0 : i32
    %c0_i32_1 = arith.constant 0 : i32
    return %1, %c0_i32, %c0_i32_0 : i32, i32, i32
  }
  func.func @transform_5(%arg0: i32, %arg1: memref<1x1xi32, #tpu.memory_space<smem>>) -> (i32, i32, i32) {
    %c0 = arith.constant 0 : index
    %0 = arith.index_cast %arg0 : i32 to index
    %1 = memref.load %arg1[%c0, %0] : memref<1x1xi32, #tpu.memory_space<smem>>
    %c0_i32 = arith.constant 0 : i32
    %c0_i32_0 = arith.constant 0 : i32
    %c0_i32_1 = arith.constant 0 : i32
    return %1, %c0_i32, %c0_i32_0 : i32, i32, i32
  }
  func.func @transform_6(%arg0: i32, %arg1: memref<1x1xi32, #tpu.memory_space<smem>>) -> (i32, i32, i32) {
    %c0 = arith.constant 0 : index
    %0 = arith.index_cast %arg0 : i32 to index
    %1 = memref.load %arg1[%c0, %0] : memref<1x1xi32, #tpu.memory_space<smem>>
    %c0_i32 = arith.constant 0 : i32
    %c0_i32_0 = arith.constant 0 : i32
    %c0_i32_1 = arith.constant 0 : i32
    return %1, %c0_i32, %c0_i32_0 : i32, i32, i32
  }
  func.func @transform_7(%arg0: i32, %arg1: memref<1x1xi32, #tpu.memory_space<smem>>) -> (i32, i32) {
    %c0_i32 = arith.constant 0 : i32
    %c0_i32_0 = arith.constant 0 : i32
    %c0_i32_1 = arith.constant 0 : i32
    return %c0_i32, %c0_i32_0 : i32, i32
  }
}

</mosaic_0001>

<bundles_post_ra>
// kernel: moe_forward.2
= control target key start
LH: loop header
LB: loop body
LE: loop exit
PB: predicated region body
PF: predicated region fallthrough
CT: control target
= control target key end

     0   :  { %11 = vsyncpa [#allocation3], 0  ;;  %s345_s0 = inlined_call_operand.vmem [shape: f32[8,32], index: 0, kind: input, shape index: {}]   ;;  %s346_s1 = inlined_call_operand.vmem [shape: f32[32,4], index: 1, kind: input, shape index: {}]   ;;  %s347_s2 = inlined_call_operand.hbm [shape: f32[1,4], index: 2, kind: input, shape index: {}]   ;;  %s348_s3 = inlined_call_operand.vmem [shape: s32[8,1], index: 3, kind: output, shape index: {0}]   ;;  %s349_s4 = inlined_call_operand.vmem [shape: f32[1,8,1], index: 4, kind: output, shape index: {1}]   ;;  %s350_s5 = inlined_call_operand.hbm [shape: s32[1,1], index: 5, kind: output, shape index: {2}]  }
   0x1   :  { %12 = vsyncpa [#allocation4], 0  ;;  %s259_s18 = smov [#allocation2]   ;;  %s211_s22 = scalar_lea.hbm %s347_s2, 16 }
   0x2   :  { %s23_s19 = sshll.u32 %s259_s18, 4  ;;  %p212_p0 = scmp.ne.s32.totalorder %s347_s2, %s211_s22  ;;  %s24_s19 = int_to_ptr.vmem [resolvable:$true] %s23_s19 }
   0x3   :  { %p215_p1 = scmp.lt.u32.totalorder %s211_s22, %s347_s2 }
   0x5   :  { %p217_p2 = pnand %p215_p1, %p212_p0 }
   0x7   :  { %220 = shalt.err (!%p217_p2)
}
   0x8   :  { %s221_s27 = scalar_lea.vmem %s24_s19, 16  ;;  %s225_s28 = scalar_lea.vmem %s24_s19, 32 }
   0x9   :  { %p222_p3 = scmp.ne.s32.totalorder %s24_s19, %s221_s27  ;;  %p226_p4 = scmp.lt.s32.totalorder %s24_s19, %s24_s19 }
   0xa   :  { %p227_p5 = scmp.lt.s32.totalorder %s225_s28, %s221_s27 }
   0xc   :  { %p228_p6 = por %p227_p5, %p226_p4 }
   0xe   :  { %p229_p7 = pnand %p228_p6, %p222_p3 }
  0x10   :  { %232 = shalt.err (!%p229_p7)
}
  0x11   :  { %26 = dma.hbm_to_vmem [thread:$0]  %s347_s2, 16, %s24_s19, [#allocation3]  }
  0x12   :  { %255 = dma.done.wait [#allocation3], 16  }
  0x13   :  { %256 = vsyncadd [#allocation3], 4294967280  ;;  %v260_v0 = vmov 0.0|0.0   ;;  %vm261_vm0 = vmmov 0   ;;  %v262_v1 = vmov 0.0   ;;  %v31_v2 = vld [vmem:[%s346_s1] sm:$0xff]  ;;  %v128_v23 = vlaneseq }
  0x14   :  { %196 = vmatprep.subr.bf16.mxu0 %v260_v0  ;;  %193 = vmatprep.mubr.msk.f32.mxu0 %vm261_vm0, %v262_v1  ;;  %v32_v3 = vld [vmem:[%s346_s1 + $0x8] sm:$0xff]  ;;  %v33_v4 = vld [vmem:[%s346_s1 + $0x10] sm:$0xff]  ;;  %v34_v6 = vld [vmem:[%s346_s1 + $0x18] sm:$0xff]  ;;  %vm42_vm1 = vcmask 261120   ;;  %vm116_vm2 = vcmask 31744   ;;  %vm150_vm3 = vcmask 7168  }
  0x15   :  { %v197_v5 = vpack.c.bf16 %v32_v3, %v31_v2  ;;  %v200_v7 = vpack.c.bf16 %v34_v6, %v33_v4  ;;  %v30_v8 = vld [vmem:[%s345_s0] sm:$0xff]  ;;  %v129_v24 = vand.u32 127, %v128_v23  ;;  %s263_s15 = smov [#allocation5]   ;;  %vm153_vm6 = vcmask 0  }
  0x16   :  { %v178_v9 = vld [vmem:[#allocation2] ss:$0 sm:$0xff]  ;;  %s165_s16 = sshll.u32 %s263_s15, 4  ;;  %s166_s16 = int_to_ptr.vmem [resolvable:$true] %s165_s16 }
  0x17   :  { %198 = vmatpush3.bf16.msra.mxu0 %v197_v5  ;;  %s233_s18 = scalar_lea.vmem %s166_s16, 16  ;;  %s237_s19 = scalar_lea.vmem %s166_s16, 32 }
  0x18   :  { %199 = vmatprep.subr.bf16.mxu0 %v260_v0  ;;  %p234_p8 = scmp.ne.s32.totalorder %s166_s16, %s233_s18  ;;  %p238_p9 = scmp.lt.s32.totalorder %s166_s16, %s166_s16 }
  0x19   :  { %p239_p10 = scmp.lt.s32.totalorder %s237_s19, %s233_s18 }
  0x1b   :  { %201 = vmatpush3.bf16.msra.mxu0 %v200_v7  ;;  %p240_p11 = por %p239_p10, %p238_p9 }
  0x1d   :  { %p241_p12 = pnand %p240_p11, %p234_p8 }
  0x1e   :  { %194 = vmatmul.mubr.msk.f32.vlgmr.msra.gmra.mrb[0].mxu0 %vm42_vm1, %v30_v8 }
  0xf1   :  { %v112_v10 = vpop.f32.mrb[0].mxu0 }
  0xf2   :  { %v113_v11 = vadd.f32 %v178_v9, %v112_v10  ;;  %v195_v12 = vpop.f32.mrb[1].mxu0 }
  0xf4   :  { %v117_v13 = vsel %vm116_vm2, %v113_v11, -inf }
  0xf5   :  { %118 = vmax.xlane.f32.xlu0 %v117_v13 }
 0x182   :  { %v119_v14 = vpop.xlane.xlu0 %118 }
 0x183   :  { %v120_v15 = vsub.f32 %v113_v11, %v119_v14 }
 0x185   :  { %v121_v16 = vmul.f32 1.442695, %v120_v15 }
 0x187   :  { %207 = vpow2.f32 %v121_v16 }
 0x191   :  { %v208_v17 = vpop.eup %207 }
 0x192   :  { %v123_v18 = vsel %vm116_vm2, %v208_v17, 0.0 }
 0x193   :  { %124 = vadd.xlane.f32.xlu0 %v123_v18 }
 0x220   :  { %v125_v19 = vpop.xlane.xlu0 %124 }
 0x221   :  { %209 = vrcp.f32 %v125_v19 }
 0x22b   :  { %v210_v20 = vpop.eup %209 }
 0x22c   :  { %v127_v21 = vmul.f32 %v210_v20, %v208_v17 }
 0x22e   :  { %v130_v22 = vsel %vm116_vm2, %v127_v21, -inf }
 0x22f   :  { %131 = vmax.xlane.f32.xlu1 %v130_v22 }
 0x2bc   :  { %v132_v25 = vpop.xlane.xlu1 %131 }
 0x2bd   :  { %vm133_vm4 = vcmp.eq.f32.partialorder %v127_v21, %v132_v25  ;;  %151 = vst.msk [vmem:[%s349_s4] sm:$0xff] %vm150_vm3, %v132_v25 }
 0x2be   :  { %v134_v26 = vsel %vm133_vm4, %v129_v24, 4 }
 0x2bf   :  { %v135_v27 = vsel %vm116_vm2, %v134_v26, 2147483647 }
 0x2c0   :  { %v137_v28 = vshra.s32 %v135_v27, 16  ;;  %v136_v30 = vand.u32 65535, %v135_v27 }
 0x2c2   :  { %v139_v29 = vcvt.s32.f32 %v137_v28  ;;  %v138_v32 = vcvt.s32.f32 %v136_v30 }
 0x2c4   :  { %140 = vmin.xlane.f32.xlu1 %v139_v29 }
 0x351   :  { %v141_v31 = vpop.xlane.xlu1 %140 }
 0x352   :  { %vm142_vm5 = vcmp.eq.f32.partialorder %v139_v29, %v141_v31  ;;  %v147_v34 = vcvt.f32.s32 %v141_v31 }
 0x353   :  { %v143_v33 = vsel %vm142_vm5, %v138_v32, inf }
 0x354   :  { %144 = vmin.xlane.f32.xlu0 %v143_v33  ;;  %v148_v36 = vshll.u32 %v147_v34, 16 }
 0x3e1   :  { %v145_v35 = vpop.xlane.xlu0 %144 }
 0x3e2   :  { %v146_v37 = vcvt.f32.s32 %v145_v35 }
 0x3e4   :  { %v149_v38 = vadd.s32 %v148_v36, %v146_v37 }
 0x3e6   :  { %152 = vst.msk [vmem:[%s348_s3] sm:$0xff] %vm150_vm3, %v149_v38 }
 0x3e7   :  { %154 = vst.msk [vmem:[#allocation5] sm:$0x1] %vm153_vm6, %v149_v38 }
 0x3e8   :  { %244 = shalt.err (!%p241_p12)
}
 0x3e9   :  { %s245_s22 = scalar_lea.hbm %s350_s5, 16 }
 0x3ea   :  { %p246_p13 = scmp.ne.s32.totalorder %s350_s5, %s245_s22  ;;  %p249_p0 = scmp.lt.u32.totalorder %s245_s22, %s350_s5 }
 0x3ec   :  { %p251_p1 = pnand %p249_p0, %p246_p13 }
 0x3ee   :  { %254 = shalt.err (!%p251_p1)
}
 0x3ef   :  { %168 = dma.vmem_to_hbm [thread:$0]  %s166_s16, 16, %s350_s5, [#allocation4]  }
 0x3f0   :  { %257 = dma.done.wait [#allocation4], 16  }
 0x3f1   :  { %258 = vsyncadd [#allocation4], 4294967280 }
 0x3f2   :  { %176 = vsyncpa [#allocation3], 1 }
 0x3f3   :  { %177 = vsyncpa [#allocation4], 1 }

// kernel: moe_forward.3
= control target key start
LH: loop header
LB: loop body
LE: loop exit
PB: predicated region body
PF: predicated region fallthrough
CT: control target
= control target key end

     0   :  { %vm127_vm0 = vcmask 261120   ;;  %v858_v0 = vmov 0.0|0.0   ;;  %vm859_vm1 = vmmov 0   ;;  %v860_v1 = vmov 0.0   ;;  %s1017_s0 = inlined_call_operand.<no memory space> [shape: s32[1,1], index: 0, kind: input, shape index: {}]   ;;  %s1018_s1 = inlined_call_operand.vmem [shape: f32[8,32], index: 1, kind: input, shape index: {}]   ;;  %s1019_s2 = inlined_call_operand.vmem [shape: f32[1,8,1], index: 2, kind: input, shape index: {}]   ;;  %s1020_s3 = inlined_call_operand.vmem [shape: f32[4,32,64], index: 3, kind: input, shape index: {}]   ;;  %s1021_s4 = inlined_call_operand.vmem [shape: f32[4,5,64], index: 4, kind: input, shape index: {}]   ;;  %s1022_s5 = inlined_call_operand.vmem [shape: f32[4,96,4], index: 5, kind: input, shape index: {}]   ;;  %s1023_s6 = inlined_call_operand.vmem [shape: f32[4,64,32], index: 6, kind: input, shape index: {}]   ;;  %s1024_s7 = inlined_call_operand.vmem [shape: f32[4,5,32], index: 7, kind: input, shape index: {}]   ;;  %s1025_s8 = inlined_call_operand.hbm [shape: f32[8,32], index: 8, kind: output, shape index: {}]  }
   0x1   :  { %p91_p0 = scmp.lt.s32.totalorder %s1017_s0, 3  ;;  %791 = vmatprep.subr.bf16.mxu0 %v858_v0  ;;  %729 = vmatprep.mubr.msk.f32.mxu0 %vm859_vm1, %v860_v1  ;;  %128 = vst.msk [vmem:[#allocation2] sm:$0xff] %vm127_vm0, %v860_v1 }
   0x2   :  { %14 = vsyncpa [#allocation6], 0  ;;  %797 = vmatprep.subr.bf16.mxu1 %v858_v0  ;;  %745 = vmatprep.mubr.msk.f32.mxu1 %vm859_vm1, %v860_v1  ;;  %v129_v14 = vld [vmem:[%s1018_s1] sm:$0xff]  ;;  %vm228_vm2 = vcmask 1043456   ;;  %vm224_vm3 = vcmask 31744   ;;  %vm386_vm4 = vcmask 523264  }
   0x3   :  { %s1027_s0 = smov (!%p91_p0, %s1017_s0), 3  ;;  %v612_v39 = vld [vmem:[%s1019_s2] sm:$0xff]  ;;  %v861_v40 = vmov 0  }
   0x4   :  { %s827_s9 = smul.u32 96, %s1027_s0  ;;  %s687_s10 = sshll.u32 %s1027_s0, 5  ;;  %833 = vset.pattern.permute.xlu0 %v861_v40 }
   0x5   :  { %s95_s13 = scalar_lea.vmem %s1020_s3, %s687_s10  ;;  %s672_s3 = sshll.u32 %s1027_s0, 3  ;;  %615 = vperm.xlu0 %833, %v612_v39  }
   0x6   :  { %s932_s16 = scalar_lea.vmem %s1022_s5, %s827_s9  ;;  %v146_v2 = vld [vmem:[%s95_s13] sm:$0xff]  ;;  %v147_v3 = vld [vmem:[%s95_s13 + $0x8] sm:$0xff]  ;;  %v148_v4 = vld [vmem:[%s95_s13 + $0x10] sm:$0xff]  ;;  %s946_s18 = scalar_lea.vmem %s1021_s4, %s672_s3 }
   0x7   :  { %v134_v5 = vld [vmem:[%s932_s16] sm:$0xff]  ;;  %v135_v6 = vld [vmem:[%s932_s16 + $0x8] sm:$0xff]  ;;  %v136_v7 = vld [vmem:[%s932_s16 + $0x10] sm:$0xff]  ;;  %v798_v8 = vpack.c.bf16 %v147_v3, %v146_v2  ;;  %s981_s21 = scalar_lea.vmem %s1024_s7, %s672_s3  ;;  %s688_s7 = sshll.u32 %s1027_s0, 6 }
   0x8   :  { %v792_v9 = vpack.c.bf16 %v135_v6, %v134_v5  ;;  %v137_v10 = vld [vmem:[%s932_s16 + $0x18] sm:$0xff]  ;;  %v131_v15 = vld [vmem:[%s946_s18 + $0x1] sm:$0xf]  ;;  %v139_v17 = vld [vmem:[%s932_s16 + $0x28] sm:$0xff]  ;;  %s115_s26 = scalar_lea.vmem %s1023_s6, %s688_s7  ;;  %s862_s0 = smov [#allocation5]  }
   0x9   :  { %v149_v11 = vld [vmem:[%s95_s13 + $0x18] sm:$0xff]  ;;  %799 = vmatpush3.bf16.msra.mxu1 %v798_v8  ;;  %v795_v13 = vpack.c.bf16 %v137_v10, %v136_v7  ;;  %v138_v16 = vld [vmem:[%s932_s16 + $0x20] sm:$0xff]  ;;  %v140_v19 = vld [vmem:[%s932_s16 + $0x30] sm:$0xff]  ;;  %s632_s2 = sshll.u32 %s862_s0, 4  ;;  %s633_s2 = int_to_ptr.vmem [resolvable:$true] %s632_s2 }
   0xa   :  { %v801_v12 = vpack.c.bf16 %v149_v11, %v148_v4  ;;  %793 = vmatpush3.bf16.msra.mxu0 %v792_v9  ;;  %800 = vmatprep.subr.bf16.mxu1 %v858_v0  ;;  %v804_v18 = vpack.c.bf16 %v139_v17, %v138_v16  ;;  %v141_v20 = vld [vmem:[%s932_s16 + $0x38] sm:$0xff]  ;;  %v142_v26 = vld [vmem:[%s932_s16 + $0x40] sm:$0xff]  ;;  %v143_v27 = vld [vmem:[%s932_s16 + $0x48] sm:$0xff]  ;;  %s834_s6 = scalar_lea.vmem %s633_s2, 128  ;;  %p839_p2 = scmp.lt.s32.totalorder %s633_s2, %s633_s2 }
   0xb   :  { %794 = vmatprep.subr.bf16.mxu0 %v858_v0  ;;  %v807_v25 = vpack.c.bf16 %v141_v20, %v140_v19  ;;  %v810_v28 = vpack.c.bf16 %v143_v27, %v142_v26  ;;  %v144_v29 = vld [vmem:[%s932_s16 + $0x50] sm:$0xff]  ;;  %v145_v30 = vld [vmem:[%s932_s16 + $0x58] sm:$0xff]  ;;  %v133_v32 = vld [vmem:[%s981_s21 + $0x1] sm:$0xf]  ;;  %p835_p1 = scmp.ne.s32.totalorder %s633_s2, %s834_s6  ;;  %p840_p3 = scmp.lt.s32.totalorder %s834_s6, %s834_s6 }
   0xc   :  { %v813_v31 = vpack.c.bf16 %v145_v30, %v144_v29  ;;  %v681_v33 = vld [vmem:[%s946_s18] ss:$0 sm:$0xff]  ;;  %v379_v42 = vld [vmem:[%s115_s26 + $0x8] sm:$0xff]  ;;  %v380_v44 = vld [vmem:[%s115_s26 + $0x10] sm:$0xff] }
   0xd   :  { %802 = vmatpush3.bf16.msra.mxu1 %v801_v12  ;;  %v378_v41 = vld [vmem:[%s115_s26] sm:$0xff]  ;;  %v381_v45 = vld [vmem:[%s115_s26 + $0x18] sm:$0xff]  ;;  %v383_v50 = vld [vmem:[%s115_s26 + $0x28] sm:$0xff]  ;;  %p841_p4 = por %p840_p3, %p839_p2 }
   0xe   :  { %796 = vmatpush3.bf16.msra.mxu0 %v795_v13  ;;  %767 = vmatprep.subr.mxu1 %v860_v1  ;;  %v816_v43 = vpack.c.bf16 %v379_v42, %v378_v41  ;;  %v819_v48 = vpack.c.bf16 %v381_v45, %v380_v44  ;;  %v382_v49 = vld [vmem:[%s115_s26 + $0x20] sm:$0xff]  ;;  %v384_v52 = vld [vmem:[%s115_s26 + $0x30] sm:$0xff]  ;;  %v385_v53 = vld [vmem:[%s115_s26 + $0x38] sm:$0xff] }
   0xf   :  { %732 = vmatprep.subr.mxu0 %v860_v1  ;;  %v822_v51 = vpack.c.bf16 %v383_v50, %v382_v49  ;;  %v825_v54 = vpack.c.bf16 %v385_v53, %v384_v52  ;;  %v686_v58 = vld [vmem:[%s981_s21] ss:$0 sm:$0xff]  ;;  %p842_p5 = pnand %p841_p4, %p835_p1 }
  0x10   :  { %746 = vmatmul.mubr.msk.f32.vlgmr.msra.gmra.mrb[0].mxu1 %vm127_vm0, %v129_v14  ;;  %v611_v63 = vld [vmem:[#allocation2] sm:$0xff] }
  0x11   :  { %730 = vmatmul.mubr.msk.f32.vlgmr.msra.gmra.mrb[0].mxu0 %vm127_vm0, %v129_v14  ;;  %769 = vmatprep.mubr.msk.f32.mxu1 %vm859_vm1, %v860_v1 }
  0x12   :  { %733 = vmatpush3.msk.msra.mxu0 %vm228_vm2, %v131_v15  ;;  %734 = vmatprep.mubr.msk.f32.mxu0 %vm859_vm1, %v860_v1 }
  0x13   :  { %803 = vmatprep.subr.bf16.mxu0 %v858_v0  ;;  %768 = vmatpush3.msk.msra.mxu1 %vm228_vm2, %v133_v32 }
  0x14   :  { %815 = vmatprep.subr.bf16.mxu1 %v858_v0 }
  0x84   :  { %v616_v61 = vpop.permute.xlu0 %615 }
  0xe3   :  { %v368_v21 = vpop.f32.mrb[0].mxu1 }
  0xe4   :  { %v220_v22 = vpop.f32.mrb[0].mxu0  ;;  %v747_v23 = vpop.f32.mrb[1].mxu1 }
  0xe5   :  { %v731_v24 = vpop.f32.mrb[1].mxu0  ;;  %735 = vmatmul.mubr.msk.f32.vlgmr.msra.gmra.mrb[2].mxu0 %vm224_vm3, %v220_v22 }
  0xe6   :  { %805 = vmatpush3.bf16.msra.mxu0 %v804_v18  ;;  %764 = vmatprep.mubr.msk.f32.mxu0 %vm859_vm1, %v860_v1 }
  0xe7   :  { %806 = vmatprep.subr.bf16.mxu0 %v858_v0 }
  0xea   :  { %808 = vmatpush3.bf16.msra.mxu0 %v807_v25 }
  0xeb   :  { %809 = vmatprep.subr.bf16.mxu0 %v858_v0 }
  0xee   :  { %811 = vmatpush3.bf16.msra.mxu0 %v810_v28 }
  0xef   :  { %812 = vmatprep.subr.bf16.mxu0 %v858_v0 }
  0xf2   :  { %814 = vmatpush3.bf16.msra.mxu0 %v813_v31 }
 0x1b8   :  { %v298_v34 = vpop.f32.mrb[2].mxu0 }
 0x1b9   :  { %v369_v35 = vadd.f32 %v368_v21, %v298_v34  ;;  %v736_v36 = vpop.f32.mrb[3].mxu0 }
 0x1bb   :  { %v376_v37 = vadd.f32 %v681_v33, %v369_v35 }
 0x1bd   :  { %v377_v38 = vmax.f32 %v376_v37, 0.0 }
 0x1bf   :  { %765 = vmatmul.mubr.msk.f32.vlgmr.msra.gmra.mrb[4].mxu0 %vm386_vm4, %v377_v38 }
 0x292   :  { %v456_v46 = vpop.f32.mrb[4].mxu0 }
 0x293   :  { %v766_v47 = vpop.f32.mrb[5].mxu0  ;;  %770 = vmatmul.mubr.msk.f32.vlgmr.msra.gmra.mrb[2].mxu1 %vm224_vm3, %v456_v46 }
 0x294   :  { %817 = vmatpush3.bf16.msra.mxu1 %v816_v43  ;;  %788 = vmatprep.mubr.msk.f32.mxu1 %vm859_vm1, %v860_v1 }
 0x295   :  { %818 = vmatprep.subr.bf16.mxu1 %v858_v0 }
 0x298   :  { %820 = vmatpush3.bf16.msra.mxu1 %v819_v48 }
 0x299   :  { %821 = vmatprep.subr.bf16.mxu1 %v858_v0 }
 0x29c   :  { %823 = vmatpush3.bf16.msra.mxu1 %v822_v51 }
 0x29d   :  { %824 = vmatprep.subr.bf16.mxu1 %v858_v0 }
 0x2a0   :  { %826 = vmatpush3.bf16.msra.mxu1 %v825_v54 }
 0x2a3   :  { %789 = vmatmul.mubr.msk.f32.vlgmr.msra.gmra.mrb[4].mxu1 %vm386_vm4, %v377_v38 }
 0x366   :  { %v532_v55 = vpop.f32.mrb[2].mxu1 }
 0x367   :  { %v771_v56 = vpop.f32.mrb[3].mxu1 }
 0x376   :  { %v602_v57 = vpop.f32.mrb[4].mxu1 }
 0x377   :  { %v603_v59 = vadd.f32 %v602_v57, %v532_v55  ;;  %v790_v60 = vpop.f32.mrb[5].mxu1 }
 0x379   :  { %v610_v62 = vadd.f32 %v686_v58, %v603_v59 }
 0x37b   :  { %v618_v1 = vmul.f32 %v616_v61, %v610_v62 }
 0x37d   :  { %v619_v2 = vadd.f32 %v618_v1, %v611_v63 }
 0x37f   :  { %620 = vst.msk [vmem:[#allocation2] sm:$0xff] %vm127_vm0, %v619_v2 }
 0x386   :  { %v624_v0 = vld [vmem:[#allocation2] sm:$0xff] }
 0x387   :  { %625 = vst.msk [vmem:[#allocation5] sm:$0xff] %vm127_vm0, %v624_v0 }
 0x388   :  { %845 = shalt.err (!%p842_p5)
}
 0x389   :  { %s846_s29 = scalar_lea.hbm %s1025_s8, 128 }
 0x38a   :  { %p847_p6 = scmp.ne.s32.totalorder %s1025_s8, %s846_s29  ;;  %p850_p7 = scmp.lt.u32.totalorder %s846_s29, %s1025_s8 }
 0x38c   :  { %p852_p8 = pnand %p850_p7, %p847_p6 }
 0x38e   :  { %855 = shalt.err (!%p852_p8)
}
 0x38f   :  { %635 = dma.vmem_to_hbm [thread:$0]  %s633_s2, 128, %s1025_s8, [#allocation6]  }
 0x390   :  { %856 = dma.done.wait [#allocation6], 128  }
 0x391   :  { %857 = vsyncadd [#allocation6], 4294967168 }
 0x392   :  { %639 = vsyncpa [#allocation6], 1 }

</bundles_post_ra>
